<compile_context>
chip_gen: v7x
topology: tpu7x:2x2x1
jax: 0.10.0
libtpu: 0.0.40
codegen_flags: <defaults>
</compile_context>

<pallas_src>
import jax
import jax.numpy as jnp
from jax.experimental import pallas as pl
from jax.experimental.pallas import tpu as pltpu

_LN_EPS = 1e-5
_LANE = 128


def _make_addnorm_kernel(valid_hidden, padded_hidden):
    """Kernel closure; knows the real hidden size when the block is lane-padded."""
    needs_mask = valid_hidden != padded_hidden
    inv_h = 1.0 / float(valid_hidden)

    def kernel(x_ref, y_ref, gb_ref, o_ref):
        # residual add (dropout == identity in eval mode), compute in f32
        z = x_ref[...].astype(jnp.float32) + y_ref[...].astype(jnp.float32)
        # Padded columns (if any) were zero-filled in the wrapper, so they
        # contribute nothing to the mean.
        mean = jnp.sum(z, axis=-1, keepdims=True) * inv_h
        centered = z - mean
        if needs_mask:
            # Zero the padded columns so they don't pollute the variance.
            lane = jax.lax.broadcasted_iota(jnp.int32, z.shape, dimension=z.ndim - 1)
            centered = jnp.where(lane < valid_hidden, centered, 0.0)
        var = jnp.sum(centered * centered, axis=-1, keepdims=True) * inv_h
        inv = jax.lax.rsqrt(var + _LN_EPS)          # eps matches nn.LayerNorm default
        g = gb_ref[0:1, :].astype(jnp.float32)
        b = gb_ref[1:2, :].astype(jnp.float32)
        o_ref[...] = (centered * inv * g + b).astype(o_ref.dtype)

    return kernel


def _vmem_capacity_bytes():
    """Physical VMEM of the current chip (conservative fallback = v7x 64 MiB)."""
    try:
        return int(pltpu.get_tpu_info().vmem_capacity_bytes)
    except Exception:
        return 64 * 1024 * 1024


def _pick_row_tile(rows, hidden, itemsize):
    """Bytes-targeted, sublane-aligned row tile with >=4 grid steps preferred."""
    sublane = 16 if itemsize < 4 else 8           # bf16 packs 2 rows/sublane
    if rows <= sublane:
        return rows                                # full-extent block is always legal

    # Bytes-based target: ~8 MiB per input block hits the HBM roofline on all
    # generations; adapts to any hidden instead of a fixed row count.
    target_bytes = 8 << 20
    cap = max(sublane, target_bytes // max(hidden * itemsize, 1))

    # Hard ceiling: double-buffered x, y, out (6*itemsize per elem) plus ~5
    # full-tile f32 temporaries (z, centered, squared, scaled, pre-cast out).
    per_row = hidden * (6 * itemsize + 5 * 4)
    budget = _vmem_capacity_bytes() // 2           # leave headroom for the compiler
    cap = min(cap, max(sublane, budget // max(per_row, 1)))

    # Keep >= 4 grid steps: per-core double-buffering when v7x shards the
    # "parallel" axis across 2 TCs; negligible overhead on v5e/v6e.
    cap = min(cap, max(sublane, -(-rows // 4)))

    tile = max((min(cap, rows) // sublane) * sublane, sublane)

    # Prefer an even grid count (2-TC load balance on v7x).
    n = -(-rows // tile)
    if n > 1 and n % 2 == 1:
        t2 = -(-rows // (n + 1))                   # rows per step for n+1 steps
        t2 = -(-t2 // sublane) * sublane           # round up to sublane
        if t2 >= sublane and (-(-rows // t2)) % 2 == 0:
            tile = t2
    return tile


def add_norm(x, y, gamma, beta):
    """LayerNorm(x + y) over the last axis. x, y: (..., hidden)."""
    assert x.shape == y.shape
    hidden = x.shape[-1]
    assert gamma.shape == (hidden,) and beta.shape == (hidden,)

    orig_shape = x.shape
    x2 = x.reshape(-1, hidden)
    y2 = y.reshape(-1, hidden)
    rows = x2.shape[0]
    itemsize = jnp.dtype(x.dtype).itemsize

    # Lane-dense output: pad hidden up to a multiple of the 128-lane width so
    # the output block stores are unmasked and the HBM writeback is dense.
    padded_hidden = (-(-hidden // _LANE)) * _LANE
    if padded_hidden != hidden:
        pad = padded_hidden - hidden
        x2 = jnp.pad(x2, ((0, 0), (0, pad)))
        y2 = jnp.pad(y2, ((0, 0), (0, pad)))
        gamma_p = jnp.pad(gamma, (0, pad))         # zeros -> padded output cols are 0
        beta_p = jnp.pad(beta, (0, pad))
    else:
        gamma_p, beta_p = gamma, beta
    gb = jnp.stack([gamma_p, beta_p])              # (2, padded_hidden), single block

    tile = _pick_row_tile(rows, padded_hidden, itemsize)
    grid = pl.cdiv(rows, tile)                     # partial last tile handled by Pallas

    # Size scoped VMEM to the real footprint (double-buffered I/O + f32 temps).
    gb_itemsize = jnp.dtype(gb.dtype).itemsize
    needed = (6 * tile * padded_hidden * itemsize          # x, y, out double-buffered
              + 5 * tile * padded_hidden * 4               # f32 intermediates
              + 2 * 2 * padded_hidden * gb_itemsize)       # gamma/beta block
    vmem_limit = int(min(0.9 * _vmem_capacity_bytes(), needed + (8 << 20)))
    vmem_limit = max(vmem_limit, 16 << 20)

    cost = pl.CostEstimate(
        flops=10 * rows * padded_hidden,
        transcendentals=rows,                      # one rsqrt per row
        bytes_accessed=3 * rows * padded_hidden * itemsize
        + 2 * padded_hidden * gb_itemsize,
    )

    kernel = _make_addnorm_kernel(hidden, padded_hidden)

    out = pl.pallas_call(
        kernel,
        out_shape=jax.ShapeDtypeStruct((rows, padded_hidden), x.dtype),
        grid_spec=pltpu.PrefetchScalarGridSpec(
            num_scalar_prefetch=0,
            grid=(grid,),
            in_specs=[
                pl.BlockSpec((tile, padded_hidden), lambda i: (i, 0)),
                pl.BlockSpec((tile, padded_hidden), lambda i: (i, 0)),
                pl.BlockSpec((2, padded_hidden), lambda i: (0, 0)),
            ],
            out_specs=pl.BlockSpec((tile, padded_hidden), lambda i: (i, 0)),
        ),
        compiler_params=pltpu.CompilerParams(
            dimension_semantics=("parallel",),
            vmem_limit_bytes=vmem_limit,
        ),
        cost_estimate=cost,
    )(x2, y2, gb)

    if padded_hidden != hidden:
        out = out[:, :hidden]
    return out.reshape(orig_shape)


if __name__ == "__main__":
    # Small shapes consistent with a transformer AddNorm:
    # batch=2, seq=8, hidden=32; normalized_shape = 32.
    batch, seq, hidden = 2, 8, 32
    key = jax.random.PRNGKey(0)
    kx, ky = jax.random.split(key)
    X = jax.random.normal(kx, (batch, seq, hidden), dtype=jnp.float32)
    Y = jax.random.normal(ky, (batch, seq, hidden), dtype=jnp.float32)

    # nn.LayerNorm default (deterministic) init: weight = 1, bias = 0
    gamma = jnp.ones((hidden,), dtype=jnp.float32)
    beta = jnp.zeros((hidden,), dtype=jnp.float32)

    out = add_norm(X, Y, gamma, beta)
    out = jax.block_until_ready(out)

    # sanity check against a pure-JAX reference
    z = X + Y
    mean = jnp.mean(z, axis=-1, keepdims=True)
    var = jnp.mean((z - mean) ** 2, axis=-1, keepdims=True)
    ref = (z - mean) / jnp.sqrt(var + 1e-5) * gamma + beta
    assert out.shape == (batch, seq, hidden)
    assert jnp.max(jnp.abs(out - ref)) < 1e-4

    print("KERNEL_OK")
</pallas_src>

<mosaic_0001>
module attributes {stable_mosaic.version = 11 : i64} {
  func.func @kernel(%arg0: i32, %arg1: memref<8x128xf32, #tpu.memory_space<vmem>>, %arg2: memref<8x128xf32, #tpu.memory_space<vmem>>, %arg3: memref<2x128xf32, #tpu.memory_space<vmem>>, %arg4: memref<8x128xf32, #tpu.memory_space<vmem>>) attributes {dimension_semantics = [#tpu.dimension_semantics<parallel>], iteration_bounds = array<i64: 2>, scalar_prefetch = 0 : i64, scratch_operands = 0 : i64, tpu.core_type = #tpu.core_type<tc>, window_params = [{transform_indices = @transform_0, window_bounds = array<i64: 8, 128>}, {transform_indices = @transform_1, window_bounds = array<i64: 8, 128>}, {pipeline_mode = #tpu.pipeline_mode<synchronous>, transform_indices = @transform_2, window_bounds = array<i64: 2, 128>}, {transform_indices = @transform_3, window_bounds = array<i64: 8, 128>}]} {
    %c0 = arith.constant 0 : index
    %c0_0 = arith.constant 0 : index
    %0 = vector.load %arg1[%c0, %c0_0] : memref<8x128xf32, #tpu.memory_space<vmem>>, vector<8x128xf32>
    %c0_1 = arith.constant 0 : index
    %c0_2 = arith.constant 0 : index
    %1 = vector.load %arg2[%c0_1, %c0_2] : memref<8x128xf32, #tpu.memory_space<vmem>>, vector<8x128xf32>
    %2 = arith.addf %0, %1 : vector<8x128xf32>
    %cst = arith.constant dense<0.000000e+00> : vector<8xf32>
    %3 = vector.multi_reduction <add>, %2, %cst [1] : vector<8x128xf32> to vector<8xf32>
    %4 = vector.shape_cast %3 : vector<8xf32> to vector<8x1xf32>
    %cst_3 = arith.constant 3.125000e-02 : f32
    %5 = vector.broadcast %cst_3 : f32 to vector<8x1xf32>
    %6 = arith.mulf %4, %5 : vector<8x1xf32>
    %7 = vector.broadcast %6 : vector<8x1xf32> to vector<8x128xf32>
    %8 = arith.subf %2, %7 : vector<8x128xf32>
    %9 = tpu.iota {dimensions = array<i32: 1>} : vector<8x128xi32>
    %c32_i32 = arith.constant 32 : i32
    %10 = vector.broadcast %c32_i32 : i32 to vector<8x128xi32>
    %11 = arith.cmpi slt, %9, %10 : vector<8x128xi32>
    %cst_4 = arith.constant 0.000000e+00 : f32
    %12 = vector.broadcast %cst_4 : f32 to vector<8x128xf32>
    %13 = arith.select %11, %8, %12 : vector<8x128xi1>, vector<8x128xf32>
    %14 = arith.mulf %13, %13 : vector<8x128xf32>
    %cst_5 = arith.constant dense<0.000000e+00> : vector<8xf32>
    %15 = vector.multi_reduction <add>, %14, %cst_5 [1] : vector<8x128xf32> to vector<8xf32>
    %16 = vector.shape_cast %15 : vector<8xf32> to vector<8x1xf32>
    %cst_6 = arith.constant 3.125000e-02 : f32
    %17 = vector.broadcast %cst_6 : f32 to vector<8x1xf32>
    %18 = arith.mulf %16, %17 : vector<8x1xf32>
    %cst_7 = arith.constant 9.99999974E-6 : f32
    %19 = vector.broadcast %cst_7 : f32 to vector<8x1xf32>
    %20 = arith.addf %18, %19 : vector<8x1xf32>
    %21 = math.rsqrt %20 : vector<8x1xf32>
    %c0_8 = arith.constant 0 : index
    %c0_9 = arith.constant 0 : index
    %22 = vector.load %arg3[%c0_8, %c0_9] : memref<2x128xf32, #tpu.memory_space<vmem>>, vector<1x128xf32>
    %c1 = arith.constant 1 : index
    %c0_10 = arith.constant 0 : index
    %23 = vector.load %arg3[%c1, %c0_10] : memref<2x128xf32, #tpu.memory_space<vmem>>, vector<1x128xf32>
    %24 = vector.broadcast %21 : vector<8x1xf32> to vector<8x128xf32>
    %25 = arith.mulf %13, %24 : vector<8x128xf32>
    %26 = vector.broadcast %22 : vector<1x128xf32> to vector<8x128xf32>
    %27 = arith.mulf %25, %26 : vector<8x128xf32>
    %28 = vector.broadcast %23 : vector<1x128xf32> to vector<8x128xf32>
    %29 = arith.addf %27, %28 : vector<8x128xf32>
    %c0_11 = arith.constant 0 : index
    %c0_12 = arith.constant 0 : index
    %30 = vector.load %arg4[%c0_11, %c0_12] : memref<8x128xf32, #tpu.memory_space<vmem>>, vector<8x128xf32>
    tpu.vector_store %arg4[%c0_11, %c0_12], %29 {strides = array<i32>} : memref<8x128xf32, #tpu.memory_space<vmem>>, vector<8x128xf32>,
    return
  }
  func.func @transform_0(%arg0: i32) -> (i32, i32) {
    %c0_i32 = arith.constant 0 : i32
    %c0_i32_0 = arith.constant 0 : i32
    return %arg0, %c0_i32 : i32, i32
  }
  func.func @transform_1(%arg0: i32) -> (i32, i32) {
    %c0_i32 = arith.constant 0 : i32
    %c0_i32_0 = arith.constant 0 : i32
    return %arg0, %c0_i32 : i32, i32
  }
  func.func @transform_2(%arg0: i32) -> (i32, i32) {
    %c0_i32 = arith.constant 0 : i32
    %c0_i32_0 = arith.constant 0 : i32
    %c0_i32_1 = arith.constant 0 : i32
    return %c0_i32, %c0_i32_0 : i32, i32
  }
  func.func @transform_3(%arg0: i32) -> (i32, i32) {
    %c0_i32 = arith.constant 0 : i32
    %c0_i32_0 = arith.constant 0 : i32
    return %arg0, %c0_i32 : i32, i32
  }
}

</mosaic_0001>

<bundles_post_ra>
// kernel: tpu_custom_call.1
= control target key start
LH: loop header
LB: loop body
LE: loop exit
PB: predicated region body
PF: predicated region fallthrough
CT: control target
= control target key end

     0   :  { %8 = vsyncpa [#allocation3], 0  ;;  %s806_s0 = inlined_call_operand.hbm [shape: f32[16,128], index: 0, kind: input, shape index: {}]   ;;  %s807_s1 = inlined_call_operand.hbm [shape: f32[16,128], index: 1, kind: input, shape index: {}]   ;;  %s808_s2 = inlined_call_operand.vmem [shape: f32[2,128], index: 2, kind: input, shape index: {}]   ;;  %s809_s3 = inlined_call_operand.hbm [shape: f32[16,128], index: 3, kind: output, shape index: {}]  }
   0x1   :  { %10 = vsyncpa [#allocation3 + $0x1], 0 }
   0x2   :  { %11 = vsyncpa [#allocation6], 0 }
   0x3   :  { %13 = vsyncpa [#allocation6 + $0x1], 0 }
   0x4   :  { %14 = vsyncpa [#allocation4], 0 }
   0x5   :  { %16 = vsyncpa [#allocation4 + $0x1], 0  ;;  %s586_s12 = smov 0   ;;  %s588_s13 = smov 0  }
   0x6   :  { %s590_s14 = smov 0   ;;  %s592_s15 = smov 0  }
   0x7 LB: > { %s607_s16 = sadd.s32 4294967295, %s561_s15   ;;  %s361_s17 = sadd.s32 4294967294, %s561_s15   ;;  %s561_s15 = sphi %s592_s15, %s828_s15   ;;  %s557_s14 = sphi %s590_s14, %s827_s14   ;;  %s553_s13 = sphi %s588_s13, %s826_s13   ;;  %s549_s12 = sphi %s586_s12, %s825_s12  }
   0x8   : > { %s611_s18 = sadd.s32 1, %s561_s15   ;;  %s29_s19 = sadd.s32 1, %s557_s14 }
   0x9   : > { %s26_s20 = ssub.s32 %s561_s15, %s611_s18  ;;  %p36_p0 = scmp.ne.s32.totalorder %s557_s14, %s553_s13 }
   0xa   : > { %p27_p1 = scmp.eq.s32.totalorder %s26_s20, 0  ;;  %p37_p2 = scmp.eq.s32.totalorder %s561_s15, 0 }
   0xb   : > { %p42_p3 = scmp.ne.s32.totalorder %s553_s13, %s549_s12  ;;  %p43_p4 = scmp.eq.s32.totalorder %s607_s16, 0 }
   0xc   : > { %s623_s21 = scalar_select %p27_p1, %s557_s14, %s29_s19  }
   0xd   : > { %p625_p5 = por %p37_p2, %p36_p0  ;;  %p629_p6 = por %p43_p4, %p42_p3 }
   0xe   : > { %p113_p7 = scmp.eq.s32.totalorder %s607_s16, 1  ;;  %p119_p8 = scmp.eq.s32.totalorder %s361_s17, 1 }
   0xf   : > { %s813_s23 = scalar_select %p629_p6, 1, 0 }
  0x10   : > { %p395_p10 = scmp.lt.s32.totalorder %s561_s15, 2  ;;  %p636_p11 = por %p113_p7, %p36_p0 }
  0x11   : > { %p640_p12 = por %p119_p8, %p42_p3  ;;  %s645_s26 = sand.u32 1, %s557_s14  }
  0x12   : > { %s814_s24 = scalar_select %p636_p11, 1, 0 }
  0x13   : > { %s815_s25 = scalar_select %p640_p12, 1, 0 }
  0x14   : > { %s365_s27 = sshll.u32 %s561_s15, 7  ;;  %s364_s28 = sshll.u32 %s645_s26, 3 }
  0x15   : > { %s654_s4 = scalar_lea.hbm %s806_s0, %s365_s27  ;;  %s146_s5 = scalar_lea.vmem [#allocation2], %s364_s28 }
  0x16   : > { %s153_s6 = sshll.u32 %s146_s5, 4  ;;  %p660_p13 = pnand %p395_p10, %p625_p5  ;;  %s664_s6 = int_to_ptr.vmem [resolvable:$true] %s153_s6 }
  0x17   : > { %s143_s8 = scalar_lea.sflag [#allocation3], %s645_s26  ;;  %s431_s9 = scalar_lea.hbm %s654_s4, 128 }
  0x18   : > { %p432_p2 = scmp.ne.s32.totalorder %s654_s4, %s431_s9  ;;  %p433_p3 = pneg %p660_p13 }
  0x19   : > { %s436_s17 = scalar_lea.hbm %s806_s0, 256  ;;  %p437_p5 = scmp.lt.u32.totalorder %s654_s4, %s806_s0 }
  0x1a   : > { %p434_p4 = pnand %p433_p3, %p432_p2  ;;  %p438_p8 = scmp.lt.u32.totalorder %s436_s17, %s431_s9 }
  0x1b   : > { %p440_p9 = scmp.lt.u32.totalorder %s431_s9, %s654_s4 }
  0x1c   : > { %p435_p7 = pneg %p434_p4  ;;  %p439_p10 = por %p438_p8, %p437_p5 }
  0x1e   : > { %p441_p0 = por %p440_p9, %p439_p10 }
  0x20   : > { %p442_p1 = pnand %p441_p0, %p435_p7 }
  0x22   : > { %445 = shalt.err (!%p442_p1)
}
  0x23   : > { %s446_s22 = scalar_lea.vmem %s664_s6, 128  ;;  %s563_s29 = smov [#allocation2]  }
  0x24   : > { %p447_p2 = scmp.ne.s32.totalorder %s664_s6, %s446_s22  ;;  %s451_s30 = sshll.u32 %s563_s29, 4  ;;  %s452_s30 = int_to_ptr.vmem [resolvable:$false] %s451_s30 }
  0x25   : > { %s453_s5 = scalar_lea.vmem %s452_s30, 256  ;;  %p454_p11 = scmp.lt.s32.totalorder %s664_s6, %s452_s30 }
  0x26   : > { %p449_p4 = pnand %p447_p2, %p433_p3  ;;  %p455_p5 = scmp.lt.s32.totalorder %s453_s5, %s446_s22 }
  0x28   : > { %p450_p12 = pneg %p449_p4  ;;  %p456_p8 = por %p455_p5, %p454_p11 }
  0x2a   : > { %p457_p9 = pnand %p456_p8, %p450_p12 }
  0x2c   : > { %460 = shalt.err (!%p457_p9)
}
  0x2d   : > { %387 = dma.hbm_to_vmem [thread:$0]  (!%p660_p13), %s654_s4, 128, %s664_s6, %s143_s8  }
  0x2e   : > { %p817_p0 = scmp.lt.s32.totalorder %s561_s15, 3  ;;  %p818_p1 = scmp.ge.s32.totalorder %s561_s15, 1 }
  0x2f   : > { %s707_s17 = scalar_lea.hbm %s807_s1, %s365_s27  ;;  %s164_s19 = scalar_lea.vmem [#allocation5], %s364_s28 }
  0x30   : > { %p698_p7 = pnand %p818_p1, %p817_p0  ;;  %s171_s20 = sshll.u32 %s164_s19, 4  ;;  %s172_s20 = int_to_ptr.vmem [resolvable:$true] %s171_s20 }
  0x31   : > { %s161_s4 = scalar_lea.sflag [#allocation6], %s645_s26  ;;  %s461_s6 = scalar_lea.hbm %s707_s17, 128 }
  0x32   : > { %s819_s9 = scalar_select %p698_p7, 1, 0 }
  0x33   : > { %p462_p11 = scmp.ne.s32.totalorder %s707_s17, %s461_s6  ;;  %s466_s27 = scalar_lea.hbm %s807_s1, 256 }
  0x34   : > { %p467_p2 = scmp.lt.u32.totalorder %s707_s17, %s807_s1  ;;  %p468_p4 = scmp.lt.u32.totalorder %s466_s27, %s461_s6 }
  0x35   : > { %p464_p12 = pnand %p462_p11, %p433_p3  ;;  %p470_p8 = scmp.lt.u32.totalorder %s461_s6, %s707_s17 }
  0x36   : > { %p469_p5 = por %p468_p4, %p467_p2 }
  0x37   : > { %p465_p10 = pneg %p464_p12 }
  0x38   : > { %p471_p9 = por %p470_p8, %p469_p5 }
  0x3a   : > { %p472_p0 = pnand %p471_p9, %p465_p10 }
  0x3c   : > { %475 = shalt.err (!%p472_p0)
}
  0x3d   : > { %s476_s26 = scalar_lea.vmem %s172_s20, 128  ;;  %s564_s28 = smov [#allocation5]  }
  0x3e   : > { %p477_p1 = scmp.ne.s32.totalorder %s172_s20, %s476_s26  ;;  %s481_s5 = sshll.u32 %s564_s28, 4  ;;  %s482_s5 = int_to_ptr.vmem [resolvable:$false] %s481_s5 }
  0x3f   : > { %s483_s10 = scalar_lea.vmem %s482_s5, 256  ;;  %p484_p6 = scmp.lt.s32.totalorder %s172_s20, %s482_s5 }
  0x40   : > { %p479_p11 = pnand %p477_p1, %p433_p3  ;;  %p485_p7 = scmp.lt.s32.totalorder %s483_s10, %s476_s26 }
  0x42   : > { %p480_p12 = pneg %p479_p11  ;;  %p486_p2 = por %p485_p7, %p484_p6 }
  0x44   : > { %p487_p4 = pnand %p486_p2, %p480_p12 }
  0x46   : > { %490 = shalt.err (!%p487_p4)
}
  0x47   : > { %390 = dma.hbm_to_vmem [thread:$0]  (!%p660_p13), %s707_s17, 128, %s172_s20, %s161_s4  }
  0x48   : > { %p820_p10 = scmp.ne.s32.totalorder %s819_s9, 0 }
  0x49   : > { %s734_s11 = sand.u32 (!%p820_p10), 1, %s553_s13   ;;  %p821_p6 = scmp.ne.s32.totalorder (!%p820_p10), %s813_s23, 0 }
  0x4a   : > { %180 = sbr.rel (%p820_p10) target bundleno = 413 (0x19d), region = 32  ;;  %s737_s19 = sshll.u32 (!%p820_p10), %s734_s11, 3 }
  0x4b   : > { %s183_s6 = scalar_lea.sflag (!%p820_p10), [#allocation3], %s734_s11  ;;  %s186_s8 = scalar_lea.vmem (!%p820_p10), [#allocation2], %s737_s19 }
  0x51   : > { %536 = dma.done.wait (%p821_p6), %s183_s6, 128  }
  0x52   : > { %538 = vsyncadd (%p821_p6), %s183_s6, 4294967168  ;;  %s192_s7 = scalar_lea.sflag [#allocation6], %s734_s11  ;;  %s195_s9 = scalar_lea.vmem [#allocation5], %s737_s19 }
  0x53   : > { %540 = dma.done.wait (%p821_p6), %s192_s7, 128  }
  0x54   : > { %542 = vsyncadd (%p821_p6), %s192_s7, 4294967168  ;;  %v223_v0 = vld [vmem:[%s186_s8] sm:$0xff]  ;;  %v224_v1 = vld [vmem:[%s195_s9] sm:$0xff]  ;;  %v230_v3 = vlaneseq  ;;  %s375_s22 = sshll.u32 %s607_s16, 7  ;;  %s222_s27 = scalar_lea.vmem [#allocation7], %s737_s19 }
  0x55   : > { %v225_v2 = vadd.f32 %v224_v1, %v223_v0  ;;  %v372_v14 = vld [vmem:[%s808_s2] ss:$0 sm:$0xff]  ;;  %v373_v16 = vld [vmem:[%s808_s2 + $0x1] ss:$0 sm:$0xff]  ;;  %s268_s29 = sshll.u32 %s222_s27, 4  ;;  %s762_s28 = scalar_lea.hbm %s809_s3, %s375_s22  ;;  %s764_s29 = int_to_ptr.vmem [resolvable:$true] %s268_s29 }
  0x56   : > { %v231_v4 = vand.u32 127, %v230_v3  ;;  %s255_s5 = scalar_lea.sflag [#allocation4], %s734_s11  ;;  %s491_s10 = scalar_lea.vmem %s764_s29, 128 }
  0x57   : > { %226 = vadd.xlane.f32.xlu0 %v225_v2  ;;  %p492_p13 = scmp.ne.s32.totalorder %s764_s29, %s491_s10  ;;  %p822_p3 = scmp.ne.s32.totalorder %s814_s24, 0 }
  0x58   : > { %vm232_vm0 = vcmp.lt.s32.totalorder %v231_v4, 32  ;;  %s565_s16 = smov [#allocation7]  }
  0x59   : > { %p493_p7 = pnand %p492_p13, %p822_p3  ;;  %s495_s19 = sshll.u32 %s565_s16, 4  ;;  %s496_s19 = int_to_ptr.vmem [resolvable:$false] %s495_s19 }
  0x5a   : > { %s497_s6 = scalar_lea.vmem %s496_s19, 256  ;;  %p498_p8 = scmp.lt.s32.totalorder %s764_s29, %s496_s19 }
  0x5b   : > { %p494_p5 = pneg %p493_p7  ;;  %p499_p9 = scmp.lt.s32.totalorder %s497_s6, %s491_s10 }
  0x5d   : > { %p500_p0 = por %p499_p9, %p498_p8 }
  0x5f   : > { %p501_p1 = pnand %p500_p0, %p494_p5 }
  0xe4   : > { %v227_v5 = vpop.xlane.xlu0 %226 }
  0xe5   : > { %v228_v6 = vmul.f32 0.03125, %v227_v5 }
  0xe7   : > { %v229_v7 = vsub.f32 %v225_v2, %v228_v6 }
  0xe9   : > { %v233_v8 = vsel %vm232_vm0, %v229_v7, 0.0 }
  0xea   : > { %v234_v9 = vmul.f32 %v233_v8, %v233_v8 }
  0xec   : > { %235 = vadd.xlane.f32.xlu0 %v234_v9 }
 0x179   : > { %v236_v10 = vpop.xlane.xlu0 %235 }
 0x17a   : > { %v237_v11 = vmul.f32 0.03125, %v236_v10 }
 0x17c   : > { %v238_v12 = vadd.f32 1e-05, %v237_v11 }
 0x17e   : > { %429 = vrsqrt.f32 %v238_v12 }
 0x188   : > { %v430_v13 = vpop.eup %429 }
 0x189   : > { %v242_v15 = vmul.f32 %v430_v13, %v233_v8 }
 0x18b   : > { %v247_v17 = vmul.f32 %v372_v14, %v242_v15 }
 0x18d   : > { %v252_v18 = vadd.f32 %v373_v16, %v247_v17 }
 0x18f   : > { %253 = vst [vmem:[%s222_s27] sm:$0xff] %v252_v18 }
 0x190   : > { %504 = shalt.err (!%p501_p1)
}
 0x191   : > { %s505_s11 = scalar_lea.hbm %s762_s28, 128  ;;  %s509_s9 = scalar_lea.hbm %s809_s3, 256 }
 0x192   : > { %p506_p11 = scmp.ne.s32.totalorder %s762_s28, %s505_s11  ;;  %p510_p4 = scmp.lt.u32.totalorder %s762_s28, %s809_s3 }
 0x193   : > { %p511_p10 = scmp.lt.u32.totalorder %s509_s9, %s505_s11  ;;  %p513_p13 = scmp.lt.u32.totalorder %s505_s11, %s762_s28 }
 0x194   : > { %p507_p12 = pnand %p506_p11, %p822_p3 }
 0x195   : > { %p512_p6 = por %p511_p10, %p510_p4 }
 0x196   : > { %p508_p2 = pneg %p507_p12 }
 0x197   : > { %p514_p7 = por %p513_p13, %p512_p6 }
 0x199   : > { %p515_p5 = pnand %p514_p7, %p508_p2 }
 0x19b   : > { %518 = shalt.err (!%p515_p5)
}
 0x19c   : > { %382 = dma.vmem_to_hbm [thread:$0]  (%p822_p3), %s764_s29, 128, %s762_s28, %s255_s5  }
 0x19d PF: > { %s280_s20 = sand.u32 1, %s549_s12   ;;  %p823_p8 = scmp.ne.s32.totalorder %s815_s25, 0 }
 0x19e   : > { %p824_p9 = scmp.ge.s32.totalorder %s561_s15, 2  ;;  %s281_s4 = scalar_lea.sflag [#allocation4], %s280_s20 }
 0x1a0   : > { %p392_p0 = pnand %p824_p9, %p823_p8 }
 0x1a2   : > { %544 = dma.done.wait (!%p392_p0), %s281_s4, 128  }
 0x1a3   : > { %546 = vsyncadd (!%p392_p0), %s281_s4, 4294967168  ;;  %p19_p1 = scmp.ge.s32.totalorder %s611_s18, 4   ;;  %s825_s12 = smov %s553_s13 }
 0x1a4   : > { %s826_s13 = smov %s557_s14  ;;  %s827_s14 = smov %s623_s21 }
 0x1a5   : > { %s828_s15 = smov %s611_s18  ;;  %21 = sbr.rel (!%p19_p1) target bundleno = 7 (0x7), region = 90 }
 0x1ac   :  { %286 = vsyncpa [#allocation3], 1 }
 0x1ad   :  { %288 = vsyncpa [#allocation3 + $0x1], 1 }
 0x1ae   :  { %289 = vsyncpa [#allocation6], 1 }
 0x1af   :  { %291 = vsyncpa [#allocation6 + $0x1], 1 }
 0x1b0   :  { %292 = vsyncpa [#allocation4], 1 }
 0x1b1   :  { %294 = vsyncpa [#allocation4 + $0x1], 1 }

</bundles_post_ra>
